<compile_context>
chip_gen: v7x
topology: tpu7x:2x2x1
jax: 0.10.0
libtpu: 0.0.40
codegen_flags: <defaults>
</compile_context>

<pallas_src>
import functools

import jax
import jax.numpy as jnp
from jax import lax
from jax.experimental import pallas as pl
from jax.experimental.pallas import tpu as pltpu


# Tile targets (per perf review: big blocks, bounded padding waste).
_TM_TARGET = 256          # rows of x resident per block
_TN_TARGET = 512          # lane-dense output tile
_TK_FULL_MAX = 2048       # if padded K <= this, keep the whole reduction in one step
_TK_TARGET = 1024         # otherwise tile K at this size (K-last accumulator kernel)
_PALLAS_MIN_WEIGHT_BYTES = 1 << 20   # below ~1 MiB of weights, plain XLA wins
_VMEM_LIMIT_FLOOR = 32 * 1024 * 1024
_VMEM_LIMIT_CAP = 48 * 1024 * 1024   # v7x has 64 MiB physical per TensorCore


def _round_up(x, m):
    return ((x + m - 1) // m) * m


def _make_kernel(has_bias, multi_k, activation):
    """Build the linear kernel body.  W is pre-transposed to [K, N]."""

    def finalize(acc_f32, b_ref, o_ref):
        out = acc_f32
        if has_bias:
            out = out + b_ref[...]
        if activation is not None:
            out = activation(out)        # elementwise only (padded tile)
        o_ref[...] = out.astype(o_ref.dtype)

    if not multi_k:
        # Whole K reduction inside one grid step: no scratch accumulator.
        if has_bias:
            def kernel(x_ref, w_ref, b_ref, o_ref):
                acc = jnp.dot(x_ref[...], w_ref[...],
                              preferred_element_type=jnp.float32)
                finalize(acc, b_ref, o_ref)
        else:
            def kernel(x_ref, w_ref, o_ref):
                acc = jnp.dot(x_ref[...], w_ref[...],
                              preferred_element_type=jnp.float32)
                finalize(acc, None, o_ref)
        return kernel

    # Multi-step K: f32 VMEM accumulator, zeroed at k==0, finalized at k==last.
    if has_bias:
        def kernel(x_ref, w_ref, b_ref, o_ref, acc_ref):
            k = pl.program_id(2)

            @pl.when(k == 0)
            def _():
                acc_ref[...] = jnp.zeros_like(acc_ref)

            acc_ref[...] += jnp.dot(x_ref[...], w_ref[...],
                                    preferred_element_type=jnp.float32)

            @pl.when(k == pl.num_programs(2) - 1)
            def _():
                finalize(acc_ref[...], b_ref, o_ref)
    else:
        def kernel(x_ref, w_ref, o_ref, acc_ref):
            k = pl.program_id(2)

            @pl.when(k == 0)
            def _():
                acc_ref[...] = jnp.zeros_like(acc_ref)

            acc_ref[...] += jnp.dot(x_ref[...], w_ref[...],
                                    preferred_element_type=jnp.float32)

            @pl.when(k == pl.num_programs(2) - 1)
            def _():
                finalize(acc_ref[...], None, o_ref)
    return kernel


class LayerHeParams:
    """Pre-transposed / pre-padded / pre-cast Layer_He parameters.

    All weight-side work (transpose to [K, N], pad to tile multiples, dtype
    cast) is done ONCE here, so the forward path never re-reads/re-writes the
    weight in HBM just to prepare it.
    """

    def __init__(self, use_pallas, input_dim, output_dim, w, bias,
                 k_pad=None, n_pad=None, tk=None, tn=None):
        self.use_pallas = use_pallas
        self.input_dim = input_dim
        self.output_dim = output_dim
        self.w = w            # pallas: [k_pad, n_pad]; fallback: [in, out]
        self.bias = bias      # pallas: [1, n_pad] f32;  fallback: [out] or None
        self.k_pad = k_pad
        self.n_pad = n_pad
        self.tk = tk
        self.tn = tn


def prepare_layer_he(weight, bias=None, *, compute_dtype=None,
                     force_pallas=False,
                     tk_full_max=_TK_FULL_MAX, tk_target=_TK_TARGET):
    """Hoisted parameter prep.  weight: [output_dim, input_dim] (PyTorch layout).

    compute_dtype=jnp.bfloat16 persists a bf16 weight (recommended on v5e/v6e:
    the small-batch case is weight-bandwidth bound, bf16 ~halves kernel time;
    accumulation stays f32).
    """
    output_dim, input_dim = weight.shape
    w_dtype = compute_dtype if compute_dtype is not None else weight.dtype
    weight_bytes = output_dim * input_dim * jnp.dtype(w_dtype).itemsize

    use_pallas = force_pallas or weight_bytes >= _PALLAS_MIN_WEIGHT_BYTES
    if not use_pallas:
        # Tiny layer: plain XLA fused dot+bias+act is strictly faster.
        return LayerHeParams(False, input_dim, output_dim, weight.T, bias)

    # ---- N tiling (lane-dense, pad up to the tile, never shrink below it) ----
    n_pad = _round_up(output_dim, 128)
    if n_pad > _TN_TARGET:
        tn = _TN_TARGET
        n_pad = _round_up(n_pad, tn)
    else:
        tn = n_pad

    # ---- K tiling: keep the whole reduction in one grid step when it fits ----
    k_pad = _round_up(input_dim, 128)
    if k_pad > tk_full_max:
        tk = tk_target
        k_pad = _round_up(k_pad, tk)
    else:
        tk = k_pad

    # One-time relayout: [out, in] -> [K, N], cast, pad.  Free in steady state.
    w_kn = jnp.pad(weight.T.astype(w_dtype),
                   ((0, k_pad - input_dim), (0, n_pad - output_dim)))
    if bias is not None:
        b_row = jnp.pad(bias.astype(jnp.float32).reshape(1, -1),
                        ((0, 0), (0, n_pad - output_dim)))
    else:
        b_row = None
    return LayerHeParams(True, input_dim, output_dim, w_kn, b_row,
                         k_pad, n_pad, tk, tn)


def layer_he_forward(x, params, activation=None):
    """y = activation(x @ W.T + b), matching Layer_He.forward.

    x: [..., input_dim].  `activation` must be elementwise.
    """
    orig_shape = x.shape
    out_dtype = x.dtype
    x2 = x.reshape(-1, orig_shape[-1])
    batch = x2.shape[0]
    assert x2.shape[1] == params.input_dim

    if not params.use_pallas:
        # XLA fallback for tiny layers; activation in f32 before cast so the
        # two code paths agree numerically.
        y = jnp.dot(x2, params.w, preferred_element_type=jnp.float32)
        if params.bias is not None:
            y = y + params.bias
        if activation is not None:
            y = activation(y)
        y = y.astype(out_dtype)
        return y.reshape(*orig_shape[:-1], params.output_dim)

    # Match the persisted weight dtype (e.g. bf16) -- cheap, x is small.
    if x2.dtype != params.w.dtype:
        x2 = x2.astype(params.w.dtype)

    # ---- M tiling: whole (padded) batch resident when it fits, else pad the
    # batch up to a multiple of the target tile (never shrink tm to 8). ----
    m_pad = _round_up(batch, 8)
    if m_pad <= _TM_TARGET:
        tm = m_pad
    else:
        tm = _TM_TARGET
        m_pad = _round_up(batch, tm)

    tn, tk = params.tn, params.tk
    n_pad, k_pad = params.n_pad, params.k_pad
    m_blocks = m_pad // tm
    n_blocks = n_pad // tn
    k_blocks = k_pad // tk

    # ---- v7x megacore: guarantee >= 2 blocks along a "parallel" axis. ----
    if m_blocks * n_blocks < 2:
        if tn % 256 == 0:                    # halve N tile (still 128-multiple)
            tn //= 2
            n_blocks = n_pad // tn
        elif m_pad >= 16:                    # otherwise split the batch
            tm = _round_up((m_pad + 1) // 2, 8)
            m_pad = 2 * tm
            m_blocks = 2

    # Only x needs per-call padding; weight/bias were padded at prep time.
    if (m_pad, k_pad) != x2.shape:
        x2 = jnp.pad(x2, ((0, m_pad - batch), (0, k_pad - x2.shape[1])))

    has_bias = params.bias is not None
    multi_k = k_blocks > 1

    # Double-buffered VMEM footprint -> explicit vmem_limit_bytes (capped for
    # v7x's 64 MiB physical VMEM).
    itemsize_x = jnp.dtype(x2.dtype).itemsize
    itemsize_w = jnp.dtype(params.w.dtype).itemsize
    itemsize_o = jnp.dtype(out_dtype).itemsize
    footprint = (2 * tm * tk * itemsize_x
                 + 2 * tk * tn * itemsize_w
                 + 2 * tm * tn * itemsize_o
                 + (2 * tn * 4 if has_bias else 0)
                 + (tm * tn * 4 if multi_k else 0))
    vmem_limit = int(min(max(2 * footprint, _VMEM_LIMIT_FLOOR), _VMEM_LIMIT_CAP))

    if not multi_k:
        grid = (m_blocks, n_blocks)
        x_spec = pl.BlockSpec((tm, tk), lambda i, j: (i, 0))
        w_spec = pl.BlockSpec((tk, tn), lambda i, j: (0, j))
        b_spec = pl.BlockSpec((1, tn), lambda i, j: (0, j))
        o_spec = pl.BlockSpec((tm, tn), lambda i, j: (i, j))
        scratch = []
        semantics = ("parallel", "parallel")
    else:
        grid = (m_blocks, n_blocks, k_blocks)
        x_spec = pl.BlockSpec((tm, tk), lambda i, j, k: (i, k))
        w_spec = pl.BlockSpec((tk, tn), lambda i, j, k: (k, j))
        b_spec = pl.BlockSpec((1, tn), lambda i, j, k: (0, j))
        o_spec = pl.BlockSpec((tm, tn), lambda i, j, k: (i, j))
        scratch = [pltpu.VMEM((tm, tn), jnp.float32)]
        semantics = ("parallel", "parallel", "arbitrary")

    kernel = _make_kernel(has_bias=has_bias, multi_k=multi_k,
                          activation=activation)
    in_specs = [x_spec, w_spec] + ([b_spec] if has_bias else [])
    operands = (x2, params.w) + ((params.bias,) if has_bias else ())

    y = pl.pallas_call(
        kernel,
        out_shape=jax.ShapeDtypeStruct((m_pad, n_pad), out_dtype),
        grid_spec=pltpu.PrefetchScalarGridSpec(
            num_scalar_prefetch=0,
            grid=grid,
            in_specs=in_specs,
            out_specs=o_spec,
            scratch_shapes=scratch),
        compiler_params=pltpu.CompilerParams(
            dimension_semantics=semantics,
            vmem_limit_bytes=vmem_limit),
    )(*operands)

    y = y[:batch, :params.output_dim]
    return y.reshape(*orig_shape[:-1], params.output_dim)


def init_layer_he_params(key, input_dim, output_dim, bias=True):
    """Deterministic parameter init matching nn.Linear + kaiming_normal_."""
    k_w, k_b = jax.random.split(key)
    std = jnp.sqrt(2.0 / input_dim)          # kaiming_normal_, fan_in, gain=sqrt(2)
    weight = std * jax.random.normal(k_w, (output_dim, input_dim), jnp.float32)
    if bias:
        bound = 1.0 / jnp.sqrt(float(input_dim))
        b = jax.random.uniform(k_b, (output_dim,), jnp.float32, -bound, bound)
    else:
        b = None
    return weight, b


if __name__ == "__main__":
    key = jax.random.PRNGKey(0)
    k_x, k_p, k_p2, k_p3 = jax.random.split(key, 4)

    # N padding (200 -> 256 lanes, then split to tn=128 for megacore), single
    # K step (640 <= 2048), fully resident batch.
    batch, input_dim, output_dim = 16, 640, 200
    x = jax.random.normal(k_x, (batch, input_dim), jnp.float32)
    weight, bias = init_layer_he_params(k_p, input_dim, output_dim, bias=True)
    y_ref = jnp.dot(x, weight.T, precision=lax.Precision.HIGHEST) + bias

    # 1) Default Layer_He (no activation), Pallas path.
    params = prepare_layer_he(weight, bias, force_pallas=True)
    y = jax.block_until_ready(layer_he_forward(x, params))
    assert y.shape == (batch, output_dim)
    assert jnp.allclose(y, y_ref, atol=2e-2, rtol=2e-2)

    # 2) relu activation, bias=False.
    weight2, _ = init_layer_he_params(k_p2, input_dim, output_dim, bias=False)
    params2 = prepare_layer_he(weight2, None, force_pallas=True)
    y2 = jax.block_until_ready(layer_he_forward(x, params2, activation=jax.nn.relu))
    y2_ref = jnp.maximum(jnp.dot(x, weight2.T, precision=lax.Precision.HIGHEST), 0.0)
    assert jnp.allclose(y2, y2_ref, atol=2e-2, rtol=2e-2)

    # 3) Persisted bf16 weight (recommended v5e/v6e path); f32 accumulation.
    params_bf16 = prepare_layer_he(weight, bias, compute_dtype=jnp.bfloat16,
                                   force_pallas=True)
    y3 = jax.block_until_ready(layer_he_forward(x, params_bf16))
    assert jnp.allclose(y3, y_ref, atol=5e-2, rtol=5e-2)

    # 4) Small output_dim (96 -> one 128-lane block): parallelism comes from
    #    splitting the batch into two M blocks.
    in3, out3 = 256, 96
    x3 = jax.random.normal(k_x, (batch, in3), jnp.float32)
    w3, b3 = init_layer_he_params(k_p3, in3, out3, bias=True)
    params3 = prepare_layer_he(w3, b3, force_pallas=True)
    y4 = jax.block_until_ready(layer_he_forward(x3, params3, activation=jax.nn.relu))
    y4_ref = jnp.maximum(jnp.dot(x3, w3.T, precision=lax.Precision.HIGHEST) + b3, 0.0)
    assert jnp.allclose(y4, y4_ref, atol=2e-2, rtol=2e-2)

    # 5) Force the multi-step-K accumulator path (used when padded K > 2048).
    params_mk = prepare_layer_he(weight, bias, force_pallas=True,
                                 tk_full_max=256, tk_target=256)
    y5 = jax.block_until_ready(layer_he_forward(x, params_mk))
    assert jnp.allclose(y5, y_ref, atol=2e-2, rtol=2e-2)

    # 6) Tiny layer (< 1 MiB of weights) -> automatic XLA fallback.
    xt = jax.random.normal(k_x, (8, 32), jnp.float32)
    wt, bt = init_layer_he_params(k_p, 32, 16, bias=True)
    pt = prepare_layer_he(wt, bt)
    assert not pt.use_pallas
    yt = jax.block_until_ready(layer_he_forward(xt, pt))
    assert jnp.allclose(yt, xt @ wt.T + bt, atol=2e-2, rtol=2e-2)

    print("KERNEL_OK")
</pallas_src>

<mosaic_0001>
module attributes {stable_mosaic.version = 11 : i64} {
  func.func @kernel(%arg0: i32, %arg1: i32, %arg2: memref<16x640xf32, #tpu.memory_space<vmem>>, %arg3: memref<640x128xf32, #tpu.memory_space<vmem>>, %arg4: memref<1x128xf32, #tpu.memory_space<vmem>>, %arg5: memref<16x128xf32, #tpu.memory_space<vmem>>) attributes {dimension_semantics = [#tpu.dimension_semantics<parallel>, #tpu.dimension_semantics<parallel>], iteration_bounds = array<i64: 1, 2>, scalar_prefetch = 0 : i64, scratch_operands = 0 : i64, tpu.core_type = #tpu.core_type<tc>, window_params = [{transform_indices = @transform_0, window_bounds = array<i64: 16, 640>}, {transform_indices = @transform_1, window_bounds = array<i64: 640, 128>}, {transform_indices = @transform_2, window_bounds = array<i64: 1, 128>}, {transform_indices = @transform_3, window_bounds = array<i64: 16, 128>}]} {
    %c0 = arith.constant 0 : index
    %c0_0 = arith.constant 0 : index
    %0 = vector.load %arg2[%c0, %c0_0] : memref<16x640xf32, #tpu.memory_space<vmem>>, vector<16x640xf32>
    %c0_1 = arith.constant 0 : index
    %c0_2 = arith.constant 0 : index
    %1 = vector.load %arg3[%c0_1, %c0_2] : memref<640x128xf32, #tpu.memory_space<vmem>>, vector<640x128xf32>
    %cst = arith.constant dense<0.000000e+00> : vector<16x128xf32>
    %2 = tpu.matmul %0, %1, %cst {dimension_numbers = #tpu.dot_dimension_numbers<[1], [0], [0], [1], [0, 0, 1, 1], [], []>} : vector<16x640xf32>, vector<640x128xf32>, vector<16x128xf32> -> vector<16x128xf32>
    %c0_3 = arith.constant 0 : index
    %c0_4 = arith.constant 0 : index
    %3 = vector.load %arg4[%c0_3, %c0_4] : memref<1x128xf32, #tpu.memory_space<vmem>>, vector<1x128xf32>
    %4 = vector.broadcast %3 : vector<1x128xf32> to vector<16x128xf32>
    %5 = arith.addf %2, %4 : vector<16x128xf32>
    %c0_5 = arith.constant 0 : index
    %c0_6 = arith.constant 0 : index
    %6 = vector.load %arg5[%c0_5, %c0_6] : memref<16x128xf32, #tpu.memory_space<vmem>>, vector<16x128xf32>
    tpu.vector_store %arg5[%c0_5, %c0_6], %5 {strides = array<i32>} : memref<16x128xf32, #tpu.memory_space<vmem>>, vector<16x128xf32>,
    return
  }
  func.func @transform_0(%arg0: i32, %arg1: i32) -> (i32, i32) {
    %c0_i32 = arith.constant 0 : i32
    %c0_i32_0 = arith.constant 0 : i32
    return %arg0, %c0_i32 : i32, i32
  }
  func.func @transform_1(%arg0: i32, %arg1: i32) -> (i32, i32) {
    %c0_i32 = arith.constant 0 : i32
    %c0_i32_0 = arith.constant 0 : i32
    return %c0_i32, %arg1 : i32, i32
  }
  func.func @transform_2(%arg0: i32, %arg1: i32) -> (i32, i32) {
    %c0_i32 = arith.constant 0 : i32
    %c0_i32_0 = arith.constant 0 : i32
    return %c0_i32, %arg1 : i32, i32
  }
  func.func @transform_3(%arg0: i32, %arg1: i32) -> (i32, i32) {
    %c0_i32 = arith.constant 0 : i32
    return %arg0, %arg1 : i32, i32
  }
}

</mosaic_0001>

<bundles_post_ra>
// kernel: tpu_custom_call.1
= control target key start
LH: loop header
LB: loop body
LE: loop exit
PB: predicated region body
PF: predicated region fallthrough
CT: control target
= control target key end

     0   :  { %8 = vsyncpa [#allocation3], 0  ;;  %s1495_s0 = inlined_call_operand.hbm [shape: f32[16,640], index: 0, kind: input, shape index: {}]   ;;  %s1496_s1 = inlined_call_operand.hbm [shape: f32[640,256], index: 1, kind: input, shape index: {}]   ;;  %s1497_s2 = inlined_call_operand.vmem [shape: f32[1,256], index: 2, kind: input, shape index: {}]   ;;  %s1498_s3 = inlined_call_operand.hbm [shape: f32[16,256], index: 3, kind: output, shape index: {}]  }
   0x1   :  { %9 = vsyncpa [#allocation6], 0 }
   0x2   :  { %11 = vsyncpa [#allocation6 + $0x1], 0 }
   0x3   :  { %12 = vsyncpa [#allocation4], 0 }
   0x4   :  { %14 = vsyncpa [#allocation4 + $0x1], 0  ;;  %s1187_s12 = smov 0   ;;  %s1189_s13 = smov 0  }
   0x5   :  { %s1191_s14 = smov 0   ;;  %s1193_s15 = smov 0  }
   0x6   :  { %s1195_s16 = smov 0   ;;  %s1197_s17 = smov 0  }
   0x7 LB: > { %s688_s18 = sadd.s32 4294967295, %s1154_s17   ;;  %s689_s19 = sadd.s32 4294967294, %s1154_s17   ;;  %s1154_s17 = sphi %s1197_s17, %s20_s17   ;;  %s1150_s16 = sphi %s1195_s16, %s1524_s16   ;;  %s1146_s15 = sphi %s1193_s15, %s1523_s15   ;;  %s1142_s14 = sphi %s1191_s14, %s1522_s14   ;;  %s1138_s13 = sphi %s1189_s13, %s1521_s13   ;;  %s1134_s12 = sphi %s1187_s12, %s1520_s12  }
   0x8   : > { %p72_p0 = scmp.ne.s32.totalorder %s1142_s14, %s1138_s13  ;;  %p73_p1 = scmp.eq.s32.totalorder %s1154_s17, 0 }
   0x9   : > { %p78_p2 = scmp.ne.s32.totalorder %s1138_s13, %s1134_s12  ;;  %p1224_p3 = scmp.eq.s32.totalorder %s688_s18, 0 }
   0xa   : > { %p1228_p4 = por %p73_p1, %p72_p0  ;;  %p130_p5 = scmp.eq.s32.totalorder %s688_s18, 1 }
   0xb   : > { %s1505_s20 = scalar_select %p1224_p3, 1, 0 }
   0xc   : > { %p1234_p6 = por %p1224_p3, %p78_p2  ;;  %p136_p7 = scmp.eq.s32.totalorder %s689_s19, 1 }
   0xd   : > { %p1238_p8 = por %p130_p5, %p72_p0  ;;  %p690_p9 = scmp.ge.s32.totalorder %s1154_s17, 1 }
   0xe   : > { %s1507_s22 = scalar_select %p1234_p6, 1, 0 }
   0xf   : > { %s1508_s23 = scalar_select %p1238_p8, 1, 0 }
  0x10   : > { %p1243_p10 = por %p136_p7, %p78_p2  ;;  %p143_p11 = scmp.lt.s32.totalorder %s1154_s17, 3 }
  0x11   : > { %s1156_s26 = smov [#allocation2]   ;;  %p950_p1 = scmp.lt.s32.totalorder %s1154_s17, 2 }
  0x12   : > { %s1509_s24 = scalar_select %p1243_p10, 1, 0 }
  0x13   : > { %p1248_p12 = pnand %p690_p9, %p143_p11  ;;  %s159_s27 = sshll.u32 %s1156_s26, 4  ;;  %s1252_s27 = int_to_ptr.vmem [resolvable:$true] %s159_s27 }
  0x14   : > { %p1266_p2 = pnand %p950_p1, %p1228_p4  ;;  %s29_s30 = sadd.s32 1, %s1150_s16 }
  0x15   : > { %s1510_s25 = scalar_select %p1248_p12, 1, 0 }
  0x16   : > { %p937_p13 = pneg %p1248_p12  ;;  %s1010_s6 = scalar_lea.hbm %s1495_s0, 1280 }
  0x17   : > { %s1512_s29 = scalar_select %p1266_p2, 1, 0 }
  0x18   : > { %p1260_p5 = pnand %p937_p13, %p1224_p3  ;;  %p1011_p7 = scmp.ne.s32.totalorder %s1495_s0, %s1010_s6 }
  0x19   : > { %p1017_p4 = scmp.lt.u32.totalorder %s1010_s6, %s1495_s0 }
  0x1a   : > { %p1012_p9 = pneg %p1260_p5 }
  0x1c   : > { %p1013_p11 = pnand %p1012_p9, %p1011_p7 }
  0x1e   : > { %p1014_p13 = pneg %p1013_p11 }
  0x20   : > { %p1019_p1 = pnand %p1017_p4, %p1014_p13 }
  0x22   : > { %1022 = shalt.err (!%p1019_p1)
}
  0x23   : > { %s1023_s11 = scalar_lea.vmem %s1252_s27, 1280  ;;  %p1031_p6 = scmp.lt.s32.totalorder %s1252_s27, %s1252_s27 }
  0x24   : > { %p1024_p0 = scmp.ne.s32.totalorder %s1252_s27, %s1023_s11  ;;  %p1032_p3 = scmp.lt.s32.totalorder %s1023_s11, %s1023_s11 }
  0x26   : > { %p1026_p10 = pnand %p1024_p0, %p1012_p9  ;;  %p1033_p12 = por %p1032_p3, %p1031_p6 }
  0x28   : > { %p1027_p8 = pneg %p1026_p10 }
  0x2a   : > { %p1034_p2 = pnand %p1033_p12, %p1027_p8 }
  0x2c   : > { %1037 = shalt.err (!%p1034_p2)
}
  0x2d   : > { %s1157_s18 = smov 640   ;;  %s1158_s19 = smov 40  }
  0x2e   : > { %940 = dma.hbm_to_vmem [thread:$0]  (!%p1260_p5), %s1495_s0, 1280, %s1252_s27, [#allocation3], %s1157_s18, %s1157_s18, %s1158_s19  }
  0x2f   : > { %p30_p10 = scmp.ge.s32.totalorder %s29_s30, 2  ;;  %s65_s4 = sadd.s32 1, %s1142_s14 }
  0x30   : > { %s173_s5 = sand.u32 1, %s1142_s14   ;;  %s693_s8 = sshll.u32 %s1150_s16, 7 }
  0x31   : > { %s1526_s30 = smov (%p30_p10, %s29_s30), 0  ;;  %s927_s6 = smul.u32 640, %s173_s5 }
  0x32   : > { %s62_s7 = ssub.s32 %s1150_s16, %s1526_s30  ;;  %s1302_s28 = scalar_lea.hbm %s1496_s1, %s693_s8 }
  0x33   : > { %p63_p3 = scmp.eq.s32.totalorder %s62_s7, 0  ;;  %s177_s27 = scalar_lea.vmem [#allocation5], %s927_s6 }
  0x34   : > { %s183_s11 = sshll.u32 %s177_s27, 4  ;;  %s1309_s19 = scalar_lea.sflag [#allocation6], %s173_s5  ;;  %s1307_s11 = int_to_ptr.vmem [resolvable:$true] %s183_s11 }
  0x35   : > { %s1305_s18 = scalar_select %p63_p3, %s1142_s14, %s65_s4  }
  0x36   : > { %s1038_s21 = scalar_lea.hbm %s1302_s28, 10240  ;;  %p1513_p8 = scmp.ne.s32.totalorder %s1512_s29, 0 }
  0x37   : > { %p1039_p6 = scmp.ne.s32.totalorder %s1302_s28, %s1038_s21  ;;  %s1043_s8 = scalar_lea.hbm %s1496_s1, 20480 }
  0x38   : > { %p1040_p12 = pneg %p1513_p8  ;;  %p1044_p2 = scmp.lt.u32.totalorder %s1302_s28, %s1496_s1 }
  0x39   : > { %p1045_p7 = scmp.lt.u32.totalorder %s1043_s8, %s1038_s21  ;;  %p1047_p11 = scmp.lt.u32.totalorder %s1038_s21, %s1302_s28 }
  0x3a   : > { %p1041_p0 = pnand %p1040_p12, %p1039_p6 }
  0x3b   : > { %p1046_p9 = por %p1045_p7, %p1044_p2 }
  0x3c   : > { %p1042_p5 = pneg %p1041_p0 }
  0x3d   : > { %p1048_p13 = por %p1047_p11, %p1046_p9 }
  0x3f   : > { %p1049_p4 = pnand %p1048_p13, %p1042_p5 }
  0x41   : > { %1052 = shalt.err (!%p1049_p4)
}
  0x42   : > { %s1053_s4 = scalar_lea.vmem %s1307_s11, 10240  ;;  %s1159_s5 = smov [#allocation5]  }
  0x43   : > { %p1054_p1 = scmp.ne.s32.totalorder %s1307_s11, %s1053_s4  ;;  %s1058_s10 = sshll.u32 %s1159_s5, 4  ;;  %s1059_s10 = int_to_ptr.vmem [resolvable:$false] %s1058_s10 }
  0x44   : > { %s1060_s27 = scalar_lea.vmem %s1059_s10, 20480  ;;  %p1061_p6 = scmp.lt.s32.totalorder %s1307_s11, %s1059_s10 }
  0x45   : > { %p1056_p10 = pnand %p1054_p1, %p1040_p12  ;;  %p1062_p0 = scmp.lt.s32.totalorder %s1060_s27, %s1053_s4 }
  0x47   : > { %p1057_p3 = pneg %p1056_p10  ;;  %p1063_p2 = por %p1062_p0, %p1061_p6 }
  0x49   : > { %p1064_p7 = pnand %p1063_p2, %p1057_p3 }
  0x4b   : > { %1067 = shalt.err (!%p1064_p7)
}
  0x4c   : > { %s1160_s21 = smov 256   ;;  %s1161_s26 = smov 128  }
  0x4d   : > { %s1162_s7 = smov 8   ;;  %p1514_p12 = scmp.ne.s32.totalorder %s1510_s25, 0 }
  0x4e   : > { %944 = dma.hbm_to_vmem [thread:$0]  (!%p1513_p8), %s1302_s28, 10240, %s1307_s11, %s1309_s19, %s1160_s21, %s1161_s26, %s1162_s7  }
  0x4f   : > { %201 = sbr.rel (%p1514_p12) target bundleno = 390 (0x186), region = 32  ;;  %p1515_p5 = scmp.ne.s32.totalorder (!%p1514_p12), %s1505_s20, 0 }
  0x56   : > { %1121 = dma.done.wait (%p1515_p5), [#allocation3], 1280  }
  0x57   : > { %1123 = vsyncadd (%p1515_p5), [#allocation3], 4294966016  ;;  %s1344_s8 = sand.u32 1, %s1138_s13   ;;  %p1516_p8 = scmp.ne.s32.totalorder %s1507_s22, 0 }
  0x58   : > { %s928_s6 = smul.u32 640, %s1344_s8  ;;  %s208_s9 = scalar_lea.sflag [#allocation6], %s1344_s8 }
  0x5a   : > { %s1348_s4 = scalar_lea.vmem [#allocation5], %s928_s6 }
  0x5b   : > { %1125 = dma.done.wait (%p1516_p8), %s208_s9, 10240  }
  0x5c   : > { %1127 = vsyncadd (%p1516_p8), %s208_s9, 4294957056  ;;  %v268_v0 = vld [vmem:[%s1348_s4 + $0x80] sm:$0xff]  ;;  %v269_v1 = vld [vmem:[%s1348_s4 + $0x88] sm:$0xff]  ;;  %p238_p9 = scmp.lt.s32.totalorder %s1146_s15, 1  ;;  %s696_s28 = sshll.u32 %s1344_s8, 4 }
  0x5d   : > { %v252_v2 = vld [vmem:[%s1348_s4] sm:$0xff]  ;;  %v831_v3 = vpack.c.bf16 %v269_v1, %v268_v0  ;;  %v253_v4 = vld [vmem:[%s1348_s4 + $0x8] sm:$0xff]  ;;  %v270_v11 = vld [vmem:[%s1348_s4 + $0x90] sm:$0xff]  ;;  %s236_s11 = scalar_lea.vmem [#allocation7], %s696_s28  ;;  %s699_s5 = sshll.u32 %s1146_s15, 7 }
  0x5e   : > { %v300_v5 = vld [vmem:[%s1348_s4 + $0x180] sm:$0xff]  ;;  %v301_v6 = vld [vmem:[%s1348_s4 + $0x188] sm:$0xff]  ;;  %v833_v7 = vpack.c.bf16 %v253_v4, %v252_v2  ;;  %v271_v13 = vld [vmem:[%s1348_s4 + $0x98] sm:$0xff]  ;;  %s239_s20 = scalar_select %p238_p9, %s1146_s15, 1 }
  0x5f   : > { %v863_v8 = vpack.c.bf16 %v301_v6, %v300_v5  ;;  %v284_v9 = vld [vmem:[%s1348_s4 + $0x100] sm:$0xff]  ;;  %v285_v10 = vld [vmem:[%s1348_s4 + $0x108] sm:$0xff]  ;;  %832 = vmatprep.subr.bf16.mxu0 %v831_v3  ;;  %v254_v14 = vld [vmem:[%s1348_s4 + $0x10] sm:$0xff]  ;;  %v835_v16 = vpack.c.bf16 %v271_v13, %v270_v11  ;;  %s582_s19 = sshll.u32 %s236_s11, 4  ;;  %s1446_s21 = scalar_lea.hbm %s1498_s3, %s699_s5  ;;  %s1441_s19 = int_to_ptr.vmem [resolvable:$true] %s582_s19 }
  0x60   : > { %v865_v12 = vpack.c.bf16 %v285_v10, %v284_v9  ;;  %v255_v15 = vld [vmem:[%s1348_s4 + $0x18] sm:$0xff]  ;;  %834 = vmatpush3.bf16.msra.mxu0 %v833_v7  ;;  %v302_v18 = vld [vmem:[%s1348_s4 + $0x190] sm:$0xff]  ;;  %v272_v23 = vld [vmem:[%s1348_s4 + $0xa0] sm:$0xff]  ;;  %s240_s29 = scalar_lea.vmem %s1497_s2, %s239_s20  ;;  %s567_s26 = scalar_lea.sflag [#allocation4], %s1344_s8 }
  0x61   : > { %864 = vmatprep.subr.bf16.mxu1 %v863_v8  ;;  %v837_v17 = vpack.c.bf16 %v255_v15, %v254_v14  ;;  %v303_v19 = vld [vmem:[%s1348_s4 + $0x198] sm:$0xff]  ;;  %v286_v20 = vld [vmem:[%s1348_s4 + $0x110] sm:$0xff]  ;;  %v273_v24 = vld [vmem:[%s1348_s4 + $0xa8] sm:$0xff]  ;;  %836 = vmatprep.subr.bf16.mxu0 %v835_v16  ;;  %s1068_s7 = scalar_lea.vmem %s1441_s19, 256  ;;  %p1517_p13 = scmp.ne.s32.totalorder %s1508_s23, 0 }
  0x62   : > { %866 = vmatpush3.bf16.msra.mxu1 %v865_v12  ;;  %v867_v21 = vpack.c.bf16 %v303_v19, %v302_v18  ;;  %v287_v22 = vld [vmem:[%s1348_s4 + $0x118] sm:$0xff]  ;;  %v839_v26 = vpack.c.bf16 %v273_v24, %v272_v23  ;;  %v256_v27 = vld [vmem:[%s1348_s4 + $0x20] sm:$0xff]  ;;  %v257_v28 = vld [vmem:[%s1348_s4 + $0x28] sm:$0xff]  ;;  %p1069_p11 = scmp.ne.s32.totalorder %s1441_s19, %s1068_s7  ;;  %s1163_s15 = smov [#allocation7]  }
  0x63   : > { %v869_v25 = vpack.c.bf16 %v287_v22, %v286_v20  ;;  %v304_v29 = vld [vmem:[%s1348_s4 + $0x1a0] sm:$0xff]  ;;  %v305_v30 = vld [vmem:[%s1348_s4 + $0x1a8] sm:$0xff]  ;;  %v841_v33 = vpack.c.bf16 %v257_v28, %v256_v27  ;;  %v274_v35 = vld [vmem:[%s1348_s4 + $0xb0] sm:$0xff]  ;;  %s1072_s6 = sshll.u32 %s1163_s15, 4  ;;  %s1073_s6 = int_to_ptr.vmem [resolvable:$false] %s1072_s6 }
  0x64   : > { %868 = vmatprep.subr.bf16.mxu1 %v867_v21  ;;  %v288_v31 = vld [vmem:[%s1348_s4 + $0x120] sm:$0xff]  ;;  %v289_v32 = vld [vmem:[%s1348_s4 + $0x128] sm:$0xff]  ;;  %838 = vmatpush3.bf16.msra.mxu0 %v837_v17  ;;  %v871_v34 = vpack.c.bf16 %v305_v30, %v304_v29  ;;  %v275_v36 = vld [vmem:[%s1348_s4 + $0xb8] sm:$0xff]  ;;  %p1070_p4 = pnand %p1069_p11, %p1517_p13  ;;  %s1074_s9 = scalar_lea.vmem %s1073_s6, 512 }
  0x65   : > { %v258_v37 = vld [vmem:[%s1348_s4 + $0x30] sm:$0xff]  ;;  %840 = vmatprep.subr.bf16.mxu0 %v839_v26  ;;  %v873_v38 = vpack.c.bf16 %v289_v32, %v288_v31  ;;  %v843_v39 = vpack.c.bf16 %v275_v36, %v274_v35  ;;  %v259_v40 = vld [vmem:[%s1348_s4 + $0x38] sm:$0xff]  ;;  %v276_v46 = vld [vmem:[%s1348_s4 + $0xc0] sm:$0xff]  ;;  %p1075_p10 = scmp.lt.s32.totalorder %s1441_s19, %s1073_s6  ;;  %p1076_p3 = scmp.lt.s32.totalorder %s1074_s9, %s1068_s7 }
  0x66   : > { %870 = vmatpush3.bf16.msra.mxu1 %v869_v25  ;;  %v306_v41 = vld [vmem:[%s1348_s4 + $0x1b0] sm:$0xff]  ;;  %v307_v42 = vld [vmem:[%s1348_s4 + $0x1b8] sm:$0xff]  ;;  %v277_v47 = vld [vmem:[%s1348_s4 + $0xc8] sm:$0xff]  ;;  %v845_v48 = vpack.c.bf16 %v259_v40, %v258_v37  ;;  %p1071_p1 = pneg %p1070_p4 }
  0x67   : > { %872 = vmatprep.subr.bf16.mxu1 %v871_v34  ;;  %v875_v43 = vpack.c.bf16 %v307_v42, %v306_v41  ;;  %v290_v44 = vld [vmem:[%s1348_s4 + $0x130] sm:$0xff]  ;;  %v291_v45 = vld [vmem:[%s1348_s4 + $0x138] sm:$0xff]  ;;  %v308_v49 = vld [vmem:[%s1348_s4 + $0x1c0] sm:$0xff]  ;;  %v847_v52 = vpack.c.bf16 %v277_v47, %v276_v46  ;;  %p1077_p6 = por %p1076_p3, %p1075_p10 }
  0x68   : > { %842 = vmatpush3.bf16.msra.mxu0 %v841_v33  ;;  %v309_v50 = vld [vmem:[%s1348_s4 + $0x1c8] sm:$0xff]  ;;  %v877_v51 = vpack.c.bf16 %v291_v45, %v290_v44  ;;  %v260_v53 = vld [vmem:[%s1348_s4 + $0x40] sm:$0xff]  ;;  %v278_v58 = vld [vmem:[%s1348_s4 + $0xd0] sm:$0xff] }
  0x69   : > { %844 = vmatprep.subr.bf16.mxu0 %v843_v39  ;;  %v261_v54 = vld [vmem:[%s1348_s4 + $0x48] sm:$0xff]  ;;  %v292_v55 = vld [vmem:[%s1348_s4 + $0x140] sm:$0xff]  ;;  %v879_v56 = vpack.c.bf16 %v309_v50, %v308_v49  ;;  %v279_v59 = vld [vmem:[%s1348_s4 + $0xd8] sm:$0xff]  ;;  %p1078_p0 = pnand %p1077_p6, %p1071_p1 }
  0x6a   : > { %874 = vmatpush3.bf16.msra.mxu1 %v873_v38  ;;  %v293_v57 = vld [vmem:[%s1348_s4 + $0x148] sm:$0xff]  ;;  %v310_v60 = vld [vmem:[%s1348_s4 + $0x1d0] sm:$0xff]  ;;  %v311_v61 = vld [vmem:[%s1348_s4 + $0x1d8] sm:$0xff]  ;;  %v849_v62 = vpack.c.bf16 %v261_v54, %v260_v53  ;;  %v851_v0 = vpack.c.bf16 %v279_v59, %v278_v58 }
  0x6b   : > { %876 = vmatprep.subr.bf16.mxu1 %v875_v43  ;;  %v881_v63 = vpack.c.bf16 %v293_v57, %v292_v55  ;;  %v262_v1 = vld [vmem:[%s1348_s4 + $0x50] sm:$0xff]  ;;  %v263_v2 = vld [vmem:[%s1348_s4 + $0x58] sm:$0xff]  ;;  %v883_v4 = vpack.c.bf16 %v311_v61, %v310_v60  ;;  %v280_v6 = vld [vmem:[%s1348_s4 + $0xe0] sm:$0xff] }
  0x6c   : > { %846 = vmatpush3.bf16.msra.mxu0 %v845_v48  ;;  %v294_v3 = vld [vmem:[%s1348_s4 + $0x150] sm:$0xff]  ;;  %v295_v5 = vld [vmem:[%s1348_s4 + $0x158] sm:$0xff]  ;;  %v281_v7 = vld [vmem:[%s1348_s4 + $0xe8] sm:$0xff]  ;;  %v853_v10 = vpack.c.bf16 %v263_v2, %v262_v1 }
  0x6d   : > { %848 = vmatprep.subr.bf16.mxu0 %v847_v52  ;;  %v312_v8 = vld [vmem:[%s1348_s4 + $0x1e0] sm:$0xff]  ;;  %v313_v9 = vld [vmem:[%s1348_s4 + $0x1e8] sm:$0xff]  ;;  %v243_v12 = vld [vmem:[#allocation2 + $0x8] sm:$0xff]  ;;  %v885_v13 = vpack.c.bf16 %v295_v5, %v294_v3  ;;  %v855_v14 = vpack.c.bf16 %v281_v7, %v280_v6 }
  0x6e   : > { %878 = vmatpush3.bf16.msra.mxu1 %v877_v51  ;;  %v264_v11 = vld [vmem:[%s1348_s4 + $0x60] sm:$0xff]  ;;  %v265_v15 = vld [vmem:[%s1348_s4 + $0x68] sm:$0xff]  ;;  %v887_v18 = vpack.c.bf16 %v313_v9, %v312_v8  ;;  %v282_v19 = vld [vmem:[%s1348_s4 + $0xf0] sm:$0xff]  ;;  %403 = vmatprep.mubr.f32.mxu0 %v243_v12 }
  0x6f   : > { %880 = vmatprep.subr.bf16.mxu1 %v879_v56  ;;  %v296_v16 = vld [vmem:[%s1348_s4 + $0x160] sm:$0xff]  ;;  %v297_v17 = vld [vmem:[%s1348_s4 + $0x168] sm:$0xff]  ;;  %v283_v20 = vld [vmem:[%s1348_s4 + $0xf8] sm:$0xff]  ;;  %v857_v24 = vpack.c.bf16 %v265_v15, %v264_v11 }
  0x70   : > { %850 = vmatpush3.bf16.msra.mxu0 %v849_v62  ;;  %v245_v21 = vld [vmem:[#allocation2 + $0x18] sm:$0xff]  ;;  %v314_v22 = vld [vmem:[%s1348_s4 + $0x1f0] sm:$0xff]  ;;  %v315_v23 = vld [vmem:[%s1348_s4 + $0x1f8] sm:$0xff]  ;;  %v889_v25 = vpack.c.bf16 %v297_v17, %v296_v16  ;;  %v859_v26 = vpack.c.bf16 %v283_v20, %v282_v19 }
  0x71   : > { %852 = vmatprep.subr.bf16.mxu0 %v851_v0  ;;  %478 = vmatprep.mubr.f32.mxu1 %v245_v21  ;;  %v266_v27 = vld [vmem:[%s1348_s4 + $0x70] sm:$0xff]  ;;  %v267_v28 = vld [vmem:[%s1348_s4 + $0x78] sm:$0xff]  ;;  %v891_v30 = vpack.c.bf16 %v315_v23, %v314_v22  ;;  %v316_v32 = vld [vmem:[%s1348_s4 + $0x200] sm:$0xff] }
  0x72   : > { %882 = vmatpush3.bf16.msra.mxu1 %v881_v63  ;;  %v298_v29 = vld [vmem:[%s1348_s4 + $0x170] sm:$0xff]  ;;  %v299_v31 = vld [vmem:[%s1348_s4 + $0x178] sm:$0xff]  ;;  %v317_v33 = vld [vmem:[%s1348_s4 + $0x208] sm:$0xff]  ;;  %v861_v34 = vpack.c.bf16 %v267_v28, %v266_v27 }
  0x73   : > { %884 = vmatprep.subr.bf16.mxu1 %v883_v4  ;;  %v893_v35 = vpack.c.bf16 %v299_v31, %v298_v29  ;;  %v895_v36 = vpack.c.bf16 %v317_v33, %v316_v32  ;;  %v318_v37 = vld [vmem:[%s1348_s4 + $0x210] sm:$0xff]  ;;  %v319_v38 = vld [vmem:[%s1348_s4 + $0x218] sm:$0xff]  ;;  %v244_v40 = vld [vmem:[#allocation2 + $0x10] sm:$0xff] }
  0x74   : > { %854 = vmatpush3.bf16.msra.mxu0 %v853_v10  ;;  %v242_v39 = vld [vmem:[#allocation2] sm:$0xff]  ;;  %v899_v41 = vpack.c.bf16 %v319_v38, %v318_v37  ;;  %v320_v42 = vld [vmem:[%s1348_s4 + $0x220] sm:$0xff]  ;;  %v321_v43 = vld [vmem:[%s1348_s4 + $0x228] sm:$0xff] }
  0x75   : > { %856 = vmatprep.subr.bf16.mxu0 %v855_v14  ;;  %v248_v44 = vld [vmem:[#allocation2 + $0x30] sm:$0xff]  ;;  %v250_v45 = vld [vmem:[#allocation2 + $0x40] sm:$0xff]  ;;  %v247_v46 = vld [vmem:[#allocation2 + $0x28] sm:$0xff]  ;;  %v903_v47 = vpack.c.bf16 %v321_v43, %v320_v42 }
  0x76   : > { %886 = vmatpush3.bf16.msra.mxu1 %v885_v13  ;;  %v249_v48 = vld [vmem:[#allocation2 + $0x38] sm:$0xff]  ;;  %v322_v49 = vld [vmem:[%s1348_s4 + $0x230] sm:$0xff]  ;;  %v323_v50 = vld [vmem:[%s1348_s4 + $0x238] sm:$0xff] }
  0x77   : > { %888 = vmatprep.subr.bf16.mxu1 %v887_v18  ;;  %v246_v51 = vld [vmem:[#allocation2 + $0x20] sm:$0xff]  ;;  %v907_v52 = vpack.c.bf16 %v323_v50, %v322_v49  ;;  %v324_v53 = vld [vmem:[%s1348_s4 + $0x240] sm:$0xff]  ;;  %v325_v54 = vld [vmem:[%s1348_s4 + $0x248] sm:$0xff] }
  0x78   : > { %858 = vmatpush3.bf16.msra.mxu0 %v857_v24  ;;  %v911_v55 = vpack.c.bf16 %v325_v54, %v324_v53  ;;  %v326_v56 = vld [vmem:[%s1348_s4 + $0x250] sm:$0xff]  ;;  %v327_v57 = vld [vmem:[%s1348_s4 + $0x258] sm:$0xff]  ;;  %v328_v59 = vld [vmem:[%s1348_s4 + $0x260] sm:$0xff] }
  0x79   : > { %860 = vmatprep.subr.bf16.mxu0 %v859_v26  ;;  %v915_v58 = vpack.c.bf16 %v327_v57, %v326_v56  ;;  %v329_v60 = vld [vmem:[%s1348_s4 + $0x268] sm:$0xff]  ;;  %v330_v62 = vld [vmem:[%s1348_s4 + $0x270] sm:$0xff]  ;;  %v331_v63 = vld [vmem:[%s1348_s4 + $0x278] sm:$0xff] }
  0x7a   : > { %890 = vmatpush3.bf16.msra.mxu1 %v889_v25  ;;  %v919_v61 = vpack.c.bf16 %v329_v60, %v328_v59  ;;  %v923_v0 = vpack.c.bf16 %v331_v63, %v330_v62  ;;  %v251_v1 = vld [vmem:[#allocation2 + $0x48] sm:$0xff]  ;;  %v697_v3 = vld [vmem:[%s240_s29] ss:$0 sm:$0xff] }
  0x7b   : > { %892 = vmatprep.subr.bf16.mxu1 %v891_v30 }
  0x7c   : > { %862 = vmatpush3.bf16.msra.mxu0 %v861_v34 }
  0x7d   : > { %896 = vmatprep.subr.bf16.mxu0 %v895_v36 }
  0x7e   : > { %894 = vmatpush3.bf16.msra.mxu1 %v893_v35 }
  0x7f   : > { %404 = vmatmul.mubr.f32.vlgmr.msra.gmra.mrb[0].mxu0 %v242_v39 }
  0x80   : > { %898 = vmatpush3.bf16.msra.mxu0 %v895_v36  ;;  %408 = vmatprep.mubr.f32.mxu0 %v248_v44 }
  0x81   : > { %479 = vmatmul.mubr.f32.vlgmr.msra.gmra.mrb[0].mxu1 %v244_v40  ;;  %900 = vmatprep.subr.bf16.mxu0 %v899_v41 }
  0x82   : > { %483 = vmatprep.mubr.f32.mxu1 %v250_v45 }
  0x83   : > { %409 = vmatmul.mubr.f32.gmra.mrb[2].mxu0 %v247_v46 }
  0x84   : > { %902 = vmatpush3.bf16.msra.mxu0 %v899_v41  ;;  %828 = vmatprep.mubr.f32.mxu0 %v246_v51 }
  0x85   : > { %484 = vmatmul.mubr.f32.gmra.mrb[2].mxu1 %v249_v48  ;;  %904 = vmatprep.subr.bf16.mxu0 %v903_v47 }
  0x88   : > { %906 = vmatpush3.bf16.msra.mxu0 %v903_v47 }
  0x89   : > { %908 = vmatprep.subr.bf16.mxu0 %v907_v52 }
  0x8c   : > { %910 = vmatpush3.bf16.msra.mxu0 %v907_v52 }
  0x8d   : > { %912 = vmatprep.subr.bf16.mxu0 %v911_v55 }
  0x90   : > { %914 = vmatpush3.bf16.msra.mxu0 %v911_v55 }
  0x91   : > { %916 = vmatprep.subr.bf16.mxu0 %v915_v58 }
  0x94   : > { %918 = vmatpush3.bf16.msra.mxu0 %v915_v58 }
  0x95   : > { %920 = vmatprep.subr.bf16.mxu0 %v919_v61 }
  0x98   : > { %922 = vmatpush3.bf16.msra.mxu0 %v919_v61 }
  0x99   : > { %924 = vmatprep.subr.bf16.mxu0 %v923_v0 }
  0x9c   : > { %926 = vmatpush3.bf16.msra.mxu0 %v923_v0 }
  0x9f   : > { %829 = vmatmul.mubr.f32.vlgmr.msra.gmra.mrb[4].mxu0 %v251_v1 }
 0x152   : > { %v734_v2 = vpop.f32.mrb[0].mxu0 }
 0x153   : > { %v735_v4 = vpop.f32.mrb[1].mxu0 }
 0x154   : > { %v772_v5 = vpop.f32.mrb[0].mxu1  ;;  %v736_v6 = vadd.f32 %v735_v4, %v734_v2 }
 0x155   : > { %v773_v7 = vpop.f32.mrb[1].mxu1 }
 0x156   : > { %v774_v8 = vadd.f32 %v773_v7, %v772_v5  ;;  %v406_v9 = vadd.f32 %v736_v6, %v697_v3  ;;  %v737_v10 = vpop.f32.mrb[2].mxu0 }
 0x157   : > { %v738_v11 = vpop.f32.mrb[3].mxu0 }
 0x158   : > { %v775_v12 = vpop.f32.mrb[2].mxu1  ;;  %v739_v13 = vadd.f32 %v738_v11, %v737_v10  ;;  %v481_v15 = vadd.f32 %v774_v8, %v406_v9 }
 0x159   : > { %v776_v14 = vpop.f32.mrb[3].mxu1 }
 0x15a   : > { %v777_v16 = vadd.f32 %v776_v14, %v775_v12  ;;  %v411_v17 = vadd.f32 %v739_v13, %v697_v3 }
 0x15c   : > { %v486_v18 = vadd.f32 %v777_v16, %v411_v17 }
 0x172   : > { %v830_v19 = vpop.f32.mrb[4].mxu0 }
 0x173   : > { %v561_v20 = vadd.f32 %v830_v19, %v486_v18  ;;  %v555_v21 = vpop.f32.mrb[5].mxu0 }
 0x174   : > { %v556_v22 = vadd.f32 %v555_v21, %v481_v15 }
 0x175   : > { %565 = vst [vmem:[%s236_s11 + $0x8] sm:$0xff] %v561_v20 }
 0x176   : > { %564 = vst [vmem:[%s236_s11] sm:$0xff] %v556_v22 }
 0x177   : > { %1081 = shalt.err (!%p1078_p0)
}
 0x178   : > { %s1082_s4 = scalar_lea.hbm %s1446_s21, 256  ;;  %s1086_s25 = scalar_lea.hbm %s1498_s3, 512 }
 0x179   : > { %p1083_p2 = scmp.ne.s32.totalorder %s1446_s21, %s1082_s4  ;;  %p1087_p5 = scmp.lt.u32.totalorder %s1446_s21, %s1498_s3 }
 0x17a   : > { %p1088_p8 = scmp.lt.u32.totalorder %s1086_s25, %s1082_s4  ;;  %p1090_p11 = scmp.lt.u32.totalorder %s1082_s4, %s1446_s21 }
 0x17b   : > { %p1084_p7 = pnand %p1083_p2, %p1517_p13 }
 0x17c   : > { %p1089_p9 = por %p1088_p8, %p1087_p5 }
 0x17d   : > { %p1085_p12 = pneg %p1084_p7 }
 0x17e   : > { %p1091_p4 = por %p1090_p11, %p1089_p9 }
 0x180   : > { %p1092_p1 = pnand %p1091_p4, %p1085_p12 }
 0x182   : > { %1095 = shalt.err (!%p1092_p1)
}
 0x183   : > { %s1164_s11 = smov 128   ;;  %s1165_s5 = smov 256  }
 0x184   : > { %s1166_s10 = smov 8  }
 0x185   : > { %935 = dma.vmem_to_hbm [thread:$0]  (%p1517_p13), %s1441_s19, 256, %s1446_s21, %s567_s26, %s1164_s11, %s1165_s5, %s1166_s10  }
 0x186 PF: > { %s597_s27 = sand.u32 1, %s1134_s12   ;;  %p1518_p10 = scmp.ne.s32.totalorder %s1509_s24, 0 }
 0x187   : > { %p1519_p3 = scmp.ge.s32.totalorder %s1154_s17, 2  ;;  %s598_s7 = scalar_lea.sflag [#allocation4], %s597_s27 }
 0x189   : > { %p946_p6 = pnand %p1519_p3, %p1518_p10 }
 0x18b   : > { %1129 = dma.done.wait (!%p946_p6), %s598_s7, 256  }
 0x18c   : > { %1131 = vsyncadd (!%p946_p6), %s598_s7, 4294967040  ;;  %s20_s17 = sadd.s32 1, %s1154_s17   ;;  %s1520_s12 = smov %s1138_s13 }
 0x18d   : > { %p17_p0 = scmp.ge.s32.totalorder %s20_s17, 4   ;;  %s1521_s13 = smov %s1142_s14 }
 0x18e   : > { %s1522_s14 = smov %s1305_s18  ;;  %s1523_s15 = smov %s1150_s16 }
 0x18f   : > { %s1524_s16 = smov %s1526_s30  ;;  %19 = sbr.rel (!%p17_p0) target bundleno = 7 (0x7), region = 86 }
 0x196   :  { %603 = vsyncpa [#allocation3], 1 }
 0x197   :  { %605 = vsyncpa [#allocation3 + $0x1], 1 }
 0x198   :  { %606 = vsyncpa [#allocation6], 1 }
 0x199   :  { %608 = vsyncpa [#allocation6 + $0x1], 1 }
 0x19a   :  { %609 = vsyncpa [#allocation4], 1 }
 0x19b   :  { %611 = vsyncpa [#allocation4 + $0x1], 1 }

</bundles_post_ra>
